<compile_context>
chip_gen: v7x
topology: tpu7x:2x2x1
jax: 0.10.0
libtpu: 0.0.40
codegen_flags: <defaults>
</compile_context>

<pallas_src>
import functools

import jax
import jax.numpy as jnp
from jax.experimental import pallas as pl
from jax.experimental.pallas import tpu as pltpu


def _ls_ce_kernel(x_ref, tgt_logit_ref, loss_ref, *, smoothing, n_rows, tile_n):
    """Smoothed-CE partial sum for one (tile_n, C) tile of logits.

    Per-row math (logprobs never materialized):
      lse      = logsumexp(x - row_max)
      nll      = lse - (x[target] - row_max)
      smooth   = lse - (sum(x) - C * row_max) / C
      loss_row = (1 - smoothing) * nll + smoothing * smooth
    Valid rows of the tile are summed in-kernel; the host divides by N.
    """
    confidence = 1.0 - smoothing

    logits = x_ref[...]                                    # (tile_n, C), input dtype
    tile_rows, c = logits.shape

    # Pre-exp math stays in the input dtype; exp-sum accumulates in f32.
    row_max = jnp.max(logits, axis=-1, keepdims=True)      # (tile_n, 1)
    shifted = logits - row_max                             # (tile_n, C)
    exp_sum = jnp.sum(jnp.exp(shifted), axis=-1, keepdims=True,
                      dtype=jnp.float32)                   # (tile_n, 1) f32
    lse = jnp.log(exp_sum)                                 # (tile_n, 1) f32

    # Single row-sum over the raw logits; derive sum(shifted) algebraically so
    # `shifted` never needs a second full-tile pass.
    sum_logits = jnp.sum(logits, axis=-1, keepdims=True).astype(jnp.float32)
    row_max_f = row_max.astype(jnp.float32)
    sum_shifted = sum_logits - c * row_max_f               # (tile_n, 1) f32

    tgt_logit = tgt_logit_ref[...]                         # (tile_n, 1) f32 (pre-gathered)
    nll_loss = lse - (tgt_logit - row_max_f)
    smooth_loss = lse - sum_shifted * (1.0 / c)
    row_loss = confidence * nll_loss + smoothing * smooth_loss   # (tile_n, 1) f32

    # Mask rows past N (padded part of the last tile) before reducing.
    row0 = pl.program_id(0) * tile_n
    row_idx = row0 + jax.lax.broadcasted_iota(jnp.int32, (tile_rows, 1), 0)
    row_loss = jnp.where(row_idx < n_rows, row_loss, 0.0)

    loss_ref[...] = jnp.sum(row_loss, keepdims=True).reshape(1, 1, 1)


def _choose_tile_n(n, c, itemsize, vmem_budget_bytes=20 * 1024 * 1024,
                   max_rows=1024):
    """Batch tile sized by double-buffered input + f32 intermediates.

    Per-row VMEM cost ~ 2*C*itemsize (double-buffered logits block) plus
    ~4*C*4 bytes of full-width f32 temporaries (shifted / exp / relayouts), so
    the whole pipeline stays well under the scoped-VMEM limits of v5e/v6e/v7x.
    Also keeps >= ~8 grid steps so DMA/compute overlap and v7x's two
    TensorCores both get work even when a single block would fit.
    """
    per_row = 2 * c * itemsize + 4 * c * 4
    rows = max(8, (vmem_budget_bytes // per_row) // 8 * 8)
    min_steps_rows = max(8, ((pl.cdiv(n, 8) + 7) // 8) * 8)
    rows = min(rows, max_rows, min_steps_rows)
    if rows >= n:
        return n   # single block: block dims == full array dims is always legal
    return rows


def label_smoothing_cross_entropy(x, target, smoothing=0.1):
    """x: [N, C] float logits (f32 or bf16); target: [N] int class ids. Scalar."""
    n, c = x.shape
    itemsize = jnp.dtype(x.dtype).itemsize
    tile_n = _choose_tile_n(n, c, itemsize)
    num_tiles = pl.cdiv(n, tile_n)

    # Hoisted target-logit gather: touches only N elements of HBM, removes all
    # one-hot work (and the int target input) from the kernel.
    tgt_logit = jnp.take_along_axis(
        x, target.astype(jnp.int32)[:, None], axis=-1).astype(jnp.float32)

    kernel = functools.partial(_ls_ce_kernel, smoothing=float(smoothing),
                               n_rows=n, tile_n=tile_n)

    # Scoped VMEM: double-buffered input block + generous f32 headroom,
    # clamped to stay comfortably inside v7x's 64 MiB physical VMEM.
    est = 2 * tile_n * c * itemsize + 4 * tile_n * c * 4 + (1 << 20)
    vmem_limit = int(min(40 * 1024 * 1024, max(16 * 1024 * 1024, est)))

    cost = pl.CostEstimate(
        flops=5 * n * c,
        transcendentals=n * c,
        bytes_accessed=n * c * itemsize + n * 4 + num_tiles * 4,
    )

    per_tile_sum = pl.pallas_call(
        kernel,
        out_shape=jax.ShapeDtypeStruct((num_tiles, 1, 1), jnp.float32),
        grid=(num_tiles,),
        in_specs=[
            pl.BlockSpec((tile_n, c), lambda i: (i, 0)),   # logits tile
            pl.BlockSpec((tile_n, 1), lambda i: (i, 0)),   # pre-gathered target logits
        ],
        out_specs=pl.BlockSpec((1, 1, 1), lambda i: (i, 0, 0)),
        compiler_params=pltpu.CompilerParams(
            dimension_semantics=("parallel",),
            vmem_limit_bytes=vmem_limit,
        ),
        cost_estimate=cost,
    )(x, tgt_logit)

    # TODO(synk): for vocabularies so large that even an 8-row x C block does
    # not fit VMEM (v7x), add a second "arbitrary" grid axis over C with an
    # online logsumexp (running max / exp-sum) in VMEM scratch.
    return jnp.sum(per_tile_sum) / n


def _reference(x, target, smoothing=0.1):
    confidence = 1.0 - smoothing
    logprobs = jax.nn.log_softmax(x.astype(jnp.float32), axis=-1)
    nll_loss = -jnp.take_along_axis(logprobs, target[:, None], axis=-1)[:, 0]
    smooth_loss = -jnp.mean(logprobs, axis=-1)
    loss = confidence * nll_loss + smoothing * smooth_loss
    return jnp.mean(loss)


if __name__ == "__main__":
    key = jax.random.PRNGKey(0)
    kx, kt = jax.random.split(key)

    N, C = 8, 32  # small shapes: batch=8, num_classes=32
    x = jax.random.normal(kx, (N, C), dtype=jnp.float32)
    target = jax.random.randint(kt, (N,), 0, C, dtype=jnp.int32)

    loss = label_smoothing_cross_entropy(x, target, smoothing=0.1)
    jax.block_until_ready(loss)

    ref = _reference(x, target, smoothing=0.1)
    assert jnp.allclose(loss, ref, atol=1e-5, rtol=1e-4), (loss, ref)

    print("KERNEL_OK")
</pallas_src>

<mosaic_0001>
module attributes {stable_mosaic.version = 11 : i64} {
  func.func @_ls_ce_kernel(%arg0: i32, %arg1: memref<8x32xf32, #tpu.memory_space<vmem>>, %arg2: memref<8x1xf32, #tpu.memory_space<vmem>>, %arg3: memref<1x1x1xf32, #tpu.memory_space<vmem>>) attributes {dimension_semantics = [#tpu.dimension_semantics<parallel>], iteration_bounds = array<i64: 1>, scalar_prefetch = 0 : i64, scratch_operands = 0 : i64, tpu.core_type = #tpu.core_type<tc>, window_params = [{transform_indices = @transform_0, window_bounds = array<i64: 8, 32>}, {transform_indices = @transform_1, window_bounds = array<i64: 8, 1>}, {transform_indices = @transform_2, window_bounds = array<i64: 1, 1, 1>}]} {
    %c0 = arith.constant 0 : index
    %c0_0 = arith.constant 0 : index
    %0 = vector.load %arg1[%c0, %c0_0] : memref<8x32xf32, #tpu.memory_space<vmem>>, vector<8x32xf32>
    %cst = arith.constant dense<0xFF800000> : vector<8xf32>
    %1 = vector.multi_reduction <maximumf>, %0, %cst [1] : vector<8x32xf32> to vector<8xf32>
    %2 = vector.shape_cast %1 : vector<8xf32> to vector<8x1xf32>
    %3 = vector.broadcast %2 : vector<8x1xf32> to vector<8x32xf32>
    %4 = arith.subf %0, %3 : vector<8x32xf32>
    %5 = math.exp %4 : vector<8x32xf32>
    %cst_1 = arith.constant dense<0.000000e+00> : vector<8xf32>
    %6 = vector.multi_reduction <add>, %5, %cst_1 [1] : vector<8x32xf32> to vector<8xf32>
    %7 = vector.shape_cast %6 : vector<8xf32> to vector<8x1xf32>
    %8 = math.log %7 : vector<8x1xf32>
    %cst_2 = arith.constant dense<0.000000e+00> : vector<8xf32>
    %9 = vector.multi_reduction <add>, %0, %cst_2 [1] : vector<8x32xf32> to vector<8xf32>
    %10 = vector.shape_cast %9 : vector<8xf32> to vector<8x1xf32>
    %cst_3 = arith.constant 3.200000e+01 : f32
    %11 = vector.broadcast %cst_3 : f32 to vector<8x1xf32>
    %12 = arith.mulf %11, %2 : vector<8x1xf32>
    %13 = arith.subf %10, %12 : vector<8x1xf32>
    %c0_4 = arith.constant 0 : index
    %c0_5 = arith.constant 0 : index
    %14 = vector.load %arg2[%c0_4, %c0_5] : memref<8x1xf32, #tpu.memory_space<vmem>>, vector<8x1xf32>
    %15 = arith.subf %14, %2 : vector<8x1xf32>
    %16 = arith.subf %8, %15 : vector<8x1xf32>
    %cst_6 = arith.constant 3.125000e-02 : f32
    %17 = vector.broadcast %cst_6 : f32 to vector<8x1xf32>
    %18 = arith.mulf %13, %17 : vector<8x1xf32>
    %19 = arith.subf %8, %18 : vector<8x1xf32>
    %cst_7 = arith.constant 0.899999976 : f32
    %20 = vector.broadcast %cst_7 : f32 to vector<8x1xf32>
    %21 = arith.mulf %20, %16 : vector<8x1xf32>
    %cst_8 = arith.constant 1.000000e-01 : f32
    %22 = vector.broadcast %cst_8 : f32 to vector<8x1xf32>
    %23 = arith.mulf %22, %19 : vector<8x1xf32>
    %24 = arith.addf %21, %23 : vector<8x1xf32>
    %c8_i32 = arith.constant 8 : i32
    %25 = arith.muli %arg0, %c8_i32 : i32
    %26 = tpu.iota {dimensions = array<i32: 0>} : vector<8x1xi32>
    %27 = vector.broadcast %25 : i32 to vector<8x1xi32>
    %28 = arith.addi %27, %26 : vector<8x1xi32>
    %c8_i32_9 = arith.constant 8 : i32
    %29 = vector.broadcast %c8_i32_9 : i32 to vector<8x1xi32>
    %30 = arith.cmpi slt, %28, %29 : vector<8x1xi32>
    %cst_10 = arith.constant 0.000000e+00 : f32
    %31 = vector.broadcast %cst_10 : f32 to vector<8x1xf32>
    %32 = arith.select %30, %24, %31 : vector<8x1xi1>, vector<8x1xf32>
    %33 = vector.shape_cast %32 : vector<8x1xf32> to vector<1x8x1xf32>
    %cst_11 = arith.constant dense<0.000000e+00> : vector<1xf32>
    %34 = vector.multi_reduction <add>, %33, %cst_11 [1, 2] : vector<1x8x1xf32> to vector<1xf32>
    %35 = vector.shape_cast %34 : vector<1xf32> to vector<1x1x1xf32>
    %36 = vector.extract %35[0, 0, 0] : f32 from vector<1x1x1xf32>
    %37 = vector.broadcast %36 : f32 to vector<1x1xf32>
    %38 = vector.shape_cast %37 : vector<1x1xf32> to vector<1x1x1xf32>
    %c0_12 = arith.constant 0 : index
    %c0_13 = arith.constant 0 : index
    %c0_14 = arith.constant 0 : index
    %39 = vector.load %arg3[%c0_12, %c0_13, %c0_14] : memref<1x1x1xf32, #tpu.memory_space<vmem>>, vector<1x1x1xf32>
    tpu.vector_store %arg3[%c0_12, %c0_13, %c0_14], %38 {strides = array<i32>} : memref<1x1x1xf32, #tpu.memory_space<vmem>>, vector<1x1x1xf32>,
    return
  }
  func.func @transform_0(%arg0: i32) -> (i32, i32) {
    %c0_i32 = arith.constant 0 : i32
    %c0_i32_0 = arith.constant 0 : i32
    return %arg0, %c0_i32 : i32, i32
  }
  func.func @transform_1(%arg0: i32) -> (i32, i32) {
    %c0_i32 = arith.constant 0 : i32
    %c0_i32_0 = arith.constant 0 : i32
    return %arg0, %c0_i32 : i32, i32
  }
  func.func @transform_2(%arg0: i32) -> (i32, i32, i32) {
    %c0_i32 = arith.constant 0 : i32
    %c0_i32_0 = arith.constant 0 : i32
    %c0_i32_1 = arith.constant 0 : i32
    return %arg0, %c0_i32, %c0_i32_0 : i32, i32, i32
  }
}

</mosaic_0001>

<bundles_post_ra>
// kernel: tpu_custom_call.1
= control target key start
LH: loop header
LB: loop body
LE: loop exit
PB: predicated region body
PF: predicated region fallthrough
CT: control target
= control target key end

     0   :  { %vm13_vm0 = vcmask 261120   ;;  %s138_s0 = inlined_call_operand.vmem [shape: f32[8,32], index: 0, kind: input, shape index: {}]   ;;  %s139_s1 = inlined_call_operand.vmem [shape: f32[8,1], index: 1, kind: input, shape index: {}]   ;;  %s140_s2 = inlined_call_operand.hbm [shape: f32[1,1,1], index: 2, kind: output, shape index: {}]  }
   0x1   :  { %v12_v0 = vld [vmem:[%s138_s0] sm:$0xff] }
   0x2   :  { %7 = vsyncpa [#allocation3], 0  ;;  %v14_v1 = vsel %vm13_vm0, %v12_v0, -inf  ;;  %v25_v2 = vsel %vm13_vm0, %v12_v0, 0.0  ;;  %v30_v12 = vld [vmem:[%s139_s1] sm:$0xff]  ;;  %vm45_vm1 = vcmask 7168  }
   0x3   :  { %15 = vmax.xlane.f32.xlu0 %v14_v1  ;;  %26 = vadd.xlane.f32.xlu1 %v25_v2  ;;  %s104_s1 = smov [#allocation2]   ;;  %vm57_vm2 = vcmask 0  }
   0x4   :  { %s65_s12 = sshll.u32 %s104_s1, 4  ;;  %s66_s12 = int_to_ptr.vmem [resolvable:$true] %s65_s12 }
   0x5   :  { %s80_s14 = scalar_lea.vmem %s66_s12, 16  ;;  %s84_s15 = scalar_lea.vmem %s66_s12, 32 }
   0x6   :  { %p81_p0 = scmp.ne.s32.totalorder %s66_s12, %s80_s14  ;;  %p85_p1 = scmp.lt.s32.totalorder %s66_s12, %s66_s12 }
   0x7   :  { %p86_p2 = scmp.lt.s32.totalorder %s84_s15, %s80_s14 }
   0x9   :  { %p87_p3 = por %p86_p2, %p85_p1 }
   0xb   :  { %p88_p4 = pnand %p87_p3, %p81_p0 }
  0x90   :  { %v16_v3 = vpop.xlane.xlu0 %15  ;;  %v27_v10 = vpop.xlane.xlu1 %26 }
  0x91   :  { %v17_v4 = vsub.f32 %v12_v0, %v16_v3  ;;  %v28_v9 = vmul.f32 32.0, %v16_v3  ;;  %v31_v14 = vsub.f32 %v30_v12, %v16_v3 }
  0x93   :  { %v18_v5 = vmul.f32 1.442695, %v17_v4  ;;  %v29_v11 = vsub.f32 %v27_v10, %v28_v9 }
  0x95   :  { %76 = vpow2.f32 %v18_v5  ;;  %v33_v15 = vmul.f32 0.03125, %v29_v11 }
  0x9f   :  { %v77_v6 = vpop.eup %76 }
  0xa0   :  { %v20_v7 = vsel %vm13_vm0, %v77_v6, 0.0 }
  0xa1   :  { %21 = vadd.xlane.f32.xlu0 %v20_v7 }
 0x12e   :  { %v22_v8 = vpop.xlane.xlu0 %21 }
 0x12f   :  { %78 = vlog2.f32 %v22_v8 }
 0x139   :  { %v79_v13 = vpop.eup %78 }
 0x13a   :  { %v24_v16 = vmul.f32 0.6931472, %v79_v13 }
 0x13c   :  { %v32_v17 = vsub.f32 %v24_v16, %v31_v14  ;;  %v34_v18 = vsub.f32 %v24_v16, %v33_v15 }
 0x13e   :  { %v35_v19 = vmul.f32 0.9, %v32_v17  ;;  %v36_v20 = vmul.f32 0.1, %v34_v18 }
 0x140   :  { %v37_v21 = vadd.f32 %v36_v20, %v35_v19 }
 0x142   :  { %v46_v22 = vsel %vm45_vm1, %v37_v21, 0.0 }
 0x143   :  { %47 = vadd.xlane.f32.xlu1 %v46_v22 }
 0x1d0   :  { %v48_v23 = vpop.xlane.xlu1 %47 }
 0x1d1   :  { %v49_v24 = vrot.slane %v48_v23, 4 }
 0x1d3   :  { %v50_v25 = vadd.f32 %v49_v24, %v48_v23 }
 0x1d5   :  { %v51_v26 = vrot.slane %v50_v25, 2 }
 0x1d7   :  { %v52_v27 = vadd.f32 %v51_v26, %v50_v25 }
 0x1d9   :  { %v53_v28 = vrot.slane %v52_v27, 1 }
 0x1db   :  { %v54_v29 = vadd.f32 %v53_v28, %v52_v27 }
 0x1dd   :  { %73 = vpush %v54_v29 }
 0x20e   :  { %s74_s13 = spop %73 }
 0x20f   :  { %v56_v30 = vstv %s74_s13 }
 0x210   :  { %58 = vst.msk [vmem:[#allocation2] sm:$0x1] %vm57_vm2, %v56_v30 }
 0x211   :  { %91 = shalt.err (!%p88_p4)
}
 0x212   :  { %s92_s18 = scalar_lea.hbm %s140_s2, 16 }
 0x213   :  { %p93_p5 = scmp.ne.s32.totalorder %s140_s2, %s92_s18  ;;  %p96_p6 = scmp.lt.u32.totalorder %s92_s18, %s140_s2 }
 0x215   :  { %p98_p7 = pnand %p96_p6, %p93_p5 }
 0x217   :  { %101 = shalt.err (!%p98_p7)
}
 0x218   :  { %68 = dma.vmem_to_hbm [thread:$0]  %s66_s12, 16, %s140_s2, [#allocation3]  }
 0x219   :  { %102 = dma.done.wait [#allocation3], 16  }
 0x21a   :  { %103 = vsyncadd [#allocation3], 4294967280 }
 0x21b   :  { %72 = vsyncpa [#allocation3], 1 }

</bundles_post_ra>
